<compile_context>
chip_gen: v5e
topology: v5e:2x2
jax: 0.10.0
libtpu: 0.0.40
codegen_flags: <defaults>
</compile_context>

<pallas_src>
import jax
import jax.numpy as jnp
from jax import lax
from jax.experimental import pallas as pl
from jax.experimental.pallas import tpu as pltpu


# ---------------------------------------------------------------------------
# Small helpers.
# ---------------------------------------------------------------------------

def _cdiv(a, b):
    return -(-a // b)


def _round_up(x, m):
    return _cdiv(x, m) * m


def _pad2(rows, cols):
    """(8,128)-tiled VMEM footprint of a 2-D f32 slice, in elements."""
    return _round_up(max(rows, 1), 8) * _round_up(max(cols, 1), 128)


def _vmem_capacity():
    try:
        return pltpu.get_tpu_info().vmem_capacity_bytes
    except Exception:
        return 64 * 1024 * 1024       # assume the smallest (v7x) if unknown


def _vmem_limit(need_bytes, vmem_capacity):
    """Explicit scoped-VMEM limit: 2x headroom, capped per generation
    (~48 MiB on v7x's 64 MiB, ~96 MiB on v5e/v6e's 128 MiB)."""
    cap = (vmem_capacity * 3) // 4
    return int(min(max(2 * need_bytes, 32 * 1024 * 1024), cap))


# ---------------------------------------------------------------------------
# Packed path: whole per-batch slabs, several batches per grid step.
# ---------------------------------------------------------------------------

def _bmm_packed_kernel(a_ref, f_ref, o_ref):
    # a_ref: (bb, N, N), f_ref: (bb, N, D), o_ref: (bb, N, D)
    o_ref[...] = jnp.einsum(
        "bij,bjd->bid",
        a_ref[...],
        f_ref[...],
        preferred_element_type=jnp.float32,
    ).astype(o_ref.dtype)


def _bmm_packed(features, A, bb, vmem_capacity):
    B, N, D = features.shape
    grid = (_cdiv(B, bb),)   # ragged last block is fine: batches are independent
    slab_padded = 4 * bb * (_pad2(N, N) + 2 * _pad2(N, D))   # one buffer set

    grid_spec = pltpu.PrefetchScalarGridSpec(
        num_scalar_prefetch=0,
        grid=grid,
        in_specs=[
            pl.BlockSpec((bb, N, N), lambda g: (g, 0, 0)),   # A
            pl.BlockSpec((bb, N, D), lambda g: (g, 0, 0)),   # features
        ],
        out_specs=pl.BlockSpec((bb, N, D), lambda g: (g, 0, 0)),
    )
    return pl.pallas_call(
        _bmm_packed_kernel,
        out_shape=jax.ShapeDtypeStruct((B, N, D), jnp.float32),
        grid_spec=grid_spec,
        compiler_params=pltpu.CompilerParams(
            dimension_semantics=("parallel",),
            # Double-buffered slabs can exceed v5e's 16 MiB scoped default;
            # set the limit explicitly (per-generation cap inside).
            vmem_limit_bytes=_vmem_limit(2 * slab_padded, vmem_capacity),
        ),
        cost_estimate=pl.CostEstimate(
            flops=2 * B * N * N * D,
            transcendentals=0,
            bytes_accessed=4 * (B * N * N + 2 * B * N * D)),
    )(A, features)


# ---------------------------------------------------------------------------
# Tiled path: grid = (B, M-tiles, D-tiles, K-tiles), accumulate into o_ref.
# ---------------------------------------------------------------------------

def _make_tiled_kernel(n_total, tk):
    rem = n_total % tk   # static: only emit K-tail masking when actually ragged

    def kernel(a_ref, f_ref, o_ref):
        # Batch dim squeezed by the BlockSpecs:
        #   a_ref: (tm, tk), f_ref: (tk, tn), o_ref: (tm, tn) [f32, resident
        #   across the k axis -> acts as the accumulator, no scratch needed]
        k = pl.program_id(3)

        @pl.when(k == 0)
        def _():
            o_ref[...] = jnp.zeros_like(o_ref)

        a = a_ref[...]
        f = f_ref[...]
        if rem:
            # Ragged K tail: zero the invalid K slice of both operands so
            # garbage from out-of-bounds block reads cannot contaminate the
            # reduction (ragged M / tn edges only touch discarded outputs).
            valid = jnp.where(k == pl.num_programs(3) - 1, rem, tk)
            col = lax.broadcasted_iota(jnp.int32, (1, tk), 1)
            row = lax.broadcasted_iota(jnp.int32, (tk, 1), 0)
            a = jnp.where(col < valid, a, 0.0)
            f = jnp.where(row < valid, f, 0.0)

        o_ref[...] += jnp.dot(a, f, preferred_element_type=jnp.float32)

    return kernel


def _bmm_tiled(features, A, tm, tn, tk, vmem_capacity):
    B, N, D = features.shape
    mt, jt, kt = _cdiv(N, tm), _cdiv(D, tn), _cdiv(N, tk)
    grid = (B, mt, jt, kt)

    # Double-buffered A / feature blocks + (resident) output block.
    need = 2 * 4 * (_pad2(tm, tk) + _pad2(tk, tn) + _pad2(tm, tn))

    grid_spec = pltpu.PrefetchScalarGridSpec(
        num_scalar_prefetch=0,
        grid=grid,
        in_specs=[
            pl.BlockSpec((None, tm, tk), lambda b, i, j, k: (b, i, k)),  # A
            pl.BlockSpec((None, tk, tn), lambda b, i, j, k: (b, k, j)),  # feat
        ],
        out_specs=pl.BlockSpec((None, tm, tn), lambda b, i, j, k: (b, i, j)),
    )
    return pl.pallas_call(
        _make_tiled_kernel(N, tk),
        out_shape=jax.ShapeDtypeStruct((B, N, D), jnp.float32),
        grid_spec=grid_spec,
        compiler_params=pltpu.CompilerParams(
            dimension_semantics=("parallel", "parallel", "parallel",
                                 "arbitrary"),
            vmem_limit_bytes=_vmem_limit(need, vmem_capacity),
        ),
        cost_estimate=pl.CostEstimate(
            flops=2 * B * N * N * D,
            transcendentals=0,
            # A is re-read jt times, features mt times, output written once.
            bytes_accessed=4 * B * (N * N * jt + N * D * mt + N * D)),
    )(A, features)


def _tile_plan(N, D, vmem_capacity):
    """Generation-aware tiles.  tm/tk target 512; tn prefers the full D so A
    streams exactly once per batch whenever the blocks fit the VMEM budget."""
    budget = (vmem_capacity * 3) // 8    # ~24 MiB on v7x, ~48 MiB on v5e/v6e

    tm = N if N <= 512 else 512          # full dim, or multiple of 8
    tk = N if N <= 512 else 512          # full dim, or multiple of 128

    def fits(tn):
        return 2 * 4 * (_pad2(tm, tk) + _pad2(tk, tn) + _pad2(tm, tn)) <= budget

    if D <= 128 or fits(D):
        tn = D                           # collapse the j axis: A read once
    else:
        tn = 128
        t = min(1024, (D // 128) * 128)
        while t >= 128:
            if fits(t):
                tn = t
                break
            t -= 128
    return tm, tn, tk


# ---------------------------------------------------------------------------
# Public wrapper (matches MeanAggregator.forward(features, A)).
# ---------------------------------------------------------------------------

_PACK_BUDGET_BYTES = 8 * 1024 * 1024   # per-grid-step slab budget (padded bytes)


def mean_aggregator(features: jax.Array, A: jax.Array, *,
                    block_m=None, block_n=None, block_k=None,
                    use_bf16: bool = False) -> jax.Array:
    """x = bmm(A, features), implemented as a Pallas TPU kernel."""
    B, N, D = features.shape
    assert A.shape == (B, N, N), f"A must be (B, N, N), got {A.shape}"
    out_dtype = features.dtype
    vmem_capacity = _vmem_capacity()

    if use_bf16:
        # Opt-in mixed precision (bf16 inputs, f32 MXU accumulation). Changes
        # numerics vs torch.bmm, so it is off by default.
        A = A.astype(jnp.bfloat16)
        features = features.astype(jnp.bfloat16)

    force_tiled = any(b is not None for b in (block_m, block_n, block_k))
    per_batch_padded = 4 * (_pad2(N, N) + 2 * _pad2(N, D))

    if not force_tiled and per_batch_padded <= _PACK_BUDGET_BYTES:
        # Packed path: as many whole batch slices per step as the budget
        # allows; keep at least 2 grid steps so v7x's 2 TensorCores both work.
        bb = max(1, min(B, _PACK_BUDGET_BYTES // per_batch_padded))
        if B > 1:
            bb = min(bb, _cdiv(B, 2))
        out = _bmm_packed(features, A, bb, vmem_capacity)
    else:
        tm_a, tn_a, tk_a = _tile_plan(N, D, vmem_capacity)
        tm = block_m or tm_a
        tn = block_n or tn_a
        tk = block_k or tk_a
        out = _bmm_tiled(features, A, tm, tn, tk, vmem_capacity)

    return out if out.dtype == out_dtype else out.astype(out_dtype)


if __name__ == "__main__":
    # MeanAggregator has no parameters — nothing to init.

    def make_inputs(key, B, N, D):
        k_a, k_f = jax.random.split(key)
        A_raw = jax.random.uniform(k_a, (B, N, N), dtype=jnp.float32)
        A = A_raw / jnp.sum(A_raw, axis=-1, keepdims=True)   # row-normalized adj
        f = jax.random.normal(k_f, (B, N, D), dtype=jnp.float32)
        return f, A

    # --- Test 1: small shapes (typical GCN-cluster regime) -> packed path.
    f1, A1 = make_inputs(jax.random.PRNGKey(0), 2, 16, 32)
    out1 = jax.block_until_ready(mean_aggregator(f1, A1))
    ref1 = jnp.einsum("bij,bjd->bid", A1, f1)
    assert out1.shape == (2, 16, 32)
    assert jnp.allclose(out1, ref1, atol=1e-5, rtol=1e-5)

    # --- Test 2: packed path with a ragged last batch block (B % bb != 0).
    f2, A2 = make_inputs(jax.random.PRNGKey(1), 3, 16, 32)
    out2 = jax.block_until_ready(mean_aggregator(f2, A2))
    ref2 = jnp.einsum("bij,bjd->bid", A2, f2)
    assert out2.shape == (3, 16, 32)
    assert jnp.allclose(out2, ref2, atol=1e-5, rtol=1e-5)

    # --- Test 3: larger shape, explicit tiles -> tiled M/J/K path including
    #     the k-axis accumulation directly into the output block.
    f3, A3 = make_inputs(jax.random.PRNGKey(2), 2, 512, 256)
    out3 = jax.block_until_ready(
        mean_aggregator(f3, A3, block_m=128, block_n=128, block_k=128))
    ref3 = jnp.einsum("bij,bjd->bid", A3, f3)
    assert out3.shape == (2, 512, 256)
    assert jnp.allclose(out3, ref3, atol=2e-5, rtol=1e-4)

    # --- Test 4: tiled path with ragged tiles (masked K tail, ragged tn edge).
    f4, A4 = make_inputs(jax.random.PRNGKey(3), 2, 384, 160)
    out4 = jax.block_until_ready(
        mean_aggregator(f4, A4, block_m=128, block_n=128, block_k=256))
    ref4 = jnp.einsum("bij,bjd->bid", A4, f4)
    assert out4.shape == (2, 384, 160)
    assert jnp.allclose(out4, ref4, atol=2e-5, rtol=1e-4)

    print("KERNEL_OK")
</pallas_src>

<mosaic_0001>
module attributes {stable_mosaic.version = 11 : i64} {
  func.func @_bmm_packed_kernel(%arg0: i32, %arg1: memref<1x16x16xf32, #tpu.memory_space<vmem>>, %arg2: memref<1x16x32xf32, #tpu.memory_space<vmem>>, %arg3: memref<1x16x32xf32, #tpu.memory_space<vmem>>) attributes {dimension_semantics = [#tpu.dimension_semantics<parallel>], iteration_bounds = array<i64: 2>, scalar_prefetch = 0 : i64, scratch_operands = 0 : i64, tpu.core_type = #tpu.core_type<tc>, window_params = [{transform_indices = @transform_0, window_bounds = array<i64: 1, 16, 16>}, {transform_indices = @transform_1, window_bounds = array<i64: 1, 16, 32>}, {transform_indices = @transform_2, window_bounds = array<i64: 1, 16, 32>}]} {
    %c0 = arith.constant 0 : index
    %c0_0 = arith.constant 0 : index
    %c0_1 = arith.constant 0 : index
    %0 = vector.load %arg1[%c0, %c0_0, %c0_1] : memref<1x16x16xf32, #tpu.memory_space<vmem>>, vector<1x16x16xf32>
    %c0_2 = arith.constant 0 : index
    %c0_3 = arith.constant 0 : index
    %c0_4 = arith.constant 0 : index
    %1 = vector.load %arg2[%c0_2, %c0_3, %c0_4] : memref<1x16x32xf32, #tpu.memory_space<vmem>>, vector<1x16x32xf32>
    "tpu.trace_start"() <{level = 10 : i32, message = "bij,bjd->bid"}> : () -> ()
    %cst = arith.constant dense<0.000000e+00> : vector<1x16x32xf32>
    %2 = tpu.matmul %0, %1, %cst {dimension_numbers = #tpu.dot_dimension_numbers<[2], [1], [1], [2], [0, 0, 0, 1, 1, 2], [0], [0]>} : vector<1x16x16xf32>, vector<1x16x32xf32>, vector<1x16x32xf32> -> vector<1x16x32xf32>
    "tpu.trace_stop"() : () -> ()
    %c0_5 = arith.constant 0 : index
    %c0_6 = arith.constant 0 : index
    %c0_7 = arith.constant 0 : index
    %3 = vector.load %arg3[%c0_5, %c0_6, %c0_7] : memref<1x16x32xf32, #tpu.memory_space<vmem>>, vector<1x16x32xf32>
    tpu.vector_store %arg3[%c0_5, %c0_6, %c0_7], %2 {strides = array<i32>} : memref<1x16x32xf32, #tpu.memory_space<vmem>>, vector<1x16x32xf32>,
    return
  }
  func.func @transform_0(%arg0: i32) -> (i32, i32, i32) {
    %c0_i32 = arith.constant 0 : i32
    %c0_i32_0 = arith.constant 0 : i32
    %c0_i32_1 = arith.constant 0 : i32
    return %arg0, %c0_i32, %c0_i32_0 : i32, i32, i32
  }
  func.func @transform_1(%arg0: i32) -> (i32, i32, i32) {
    %c0_i32 = arith.constant 0 : i32
    %c0_i32_0 = arith.constant 0 : i32
    %c0_i32_1 = arith.constant 0 : i32
    return %arg0, %c0_i32, %c0_i32_0 : i32, i32, i32
  }
  func.func @transform_2(%arg0: i32) -> (i32, i32, i32) {
    %c0_i32 = arith.constant 0 : i32
    %c0_i32_0 = arith.constant 0 : i32
    %c0_i32_1 = arith.constant 0 : i32
    return %arg0, %c0_i32, %c0_i32_0 : i32, i32, i32
  }
}

</mosaic_0001>

<bundles_post_ra>
// kernel: tpu_custom_call.1
= control target key start
LH: loop header
LB: loop body
LE: loop exit
PB: predicated region body
PF: predicated region fallthrough
CT: control target
= control target key end

     0   :  { %7 = vsyncpa [#allocation3], 0  ;;  %s754_s0 = inlined_call_operand.hbm [shape: f32[2,16,16], index: 0, kind: input, shape index: {}]   ;;  %s755_s1 = inlined_call_operand.hbm [shape: f32[2,16,32], index: 1, kind: input, shape index: {}]   ;;  %s756_s2 = inlined_call_operand.hbm [shape: f32[2,16,32], index: 2, kind: output, shape index: {}]  }
   0x1   :  { %9 = vsyncpa [#allocation3 + $0x1], 0 }
   0x2   :  { %10 = vsyncpa [#allocation6], 0 }
   0x3   :  { %12 = vsyncpa [#allocation6 + $0x1], 0 }
   0x4   :  { %13 = vsyncpa [#allocation4], 0 }
   0x5   :  { %15 = vsyncpa [#allocation4 + $0x1], 0  ;;  %s586_s9 = smov 0   ;;  %s588_s10 = smov 0  }
   0x6   :  { %s590_s11 = smov 0   ;;  %s592_s12 = smov 0  }
   0x7 LB: > { %s607_s13 = sadd.s32 4294967295, %s565_s12   ;;  %s355_s14 = sadd.s32 4294967294, %s565_s12   ;;  %s565_s12 = sphi %s592_s12, %s767_s12   ;;  %s561_s11 = sphi %s590_s11, %s766_s11   ;;  %s557_s10 = sphi %s588_s10, %s765_s10   ;;  %s553_s9 = sphi %s586_s9, %s764_s9  }
   0x8   : > { %s611_s15 = sadd.s32 1, %s565_s12   ;;  %s28_s16 = sadd.s32 1, %s561_s11 }
   0x9   : > { %s25_s17 = ssub.s32 %s565_s12, %s611_s15  ;;  %p35_p0 = scmp.ne.s32.totalorder %s561_s11, %s557_s10 }
   0xa   : > { %p26_p1 = scmp.eq.s32.totalorder %s25_s17, 0  ;;  %p36_p2 = scmp.eq.s32.totalorder %s565_s12, 0 }
   0xb   : > { %p41_p3 = scmp.ne.s32.totalorder %s557_s10, %s553_s9  ;;  %p42_p4 = scmp.eq.s32.totalorder %s607_s13, 0 }
   0xc   : > { %s623_s18 = scalar_select %p26_p1, %s561_s11, %s28_s16  }
   0xd   : > { %p625_p5 = por %p36_p2, %p35_p0  ;;  %p629_p6 = por %p42_p4, %p41_p3 }
   0xe   : > { %p91_p7 = scmp.eq.s32.totalorder %s607_s13, 1  ;;  %p97_p8 = scmp.eq.s32.totalorder %s355_s14, 1 }
   0xf   : > { %p397_p10 = scmp.lt.s32.totalorder %s565_s12, 2  ;;  %s645_s23 = sand.u32 1, %s561_s11  }
  0x10   : > { %p636_p11 = por %p91_p7, %p35_p0  ;;  %p640_p12 = por %p97_p8, %p41_p3 }
  0x11   : > { %s375_s24 = sshll.u32 %s565_s12, 4  ;;  %s358_s25 = sshll.u32 %s645_s23, 4 }
  0x12   : > { %s126_s28 = scalar_lea.hbm %s754_s0, %s375_s24  ;;  %s121_s30 = scalar_lea.vmem [#allocation2], %s358_s25 }
  0x13   : > { %s127_s29 = sshll.u32 %s126_s28, 4  ;;  %s129_s3 = sshll.u32 %s121_s30, 4  ;;  %s128_s29 = int_to_ptr.hbm [resolvable:$true] %s127_s29  ;;  %s130_s3 = int_to_ptr.vmem [resolvable:$true] %s129_s3 }
  0x14   : > { %p658_p13 = pnand %p397_p10, %p625_p5  ;;  %p364_p0 = scmp.ge.s32.totalorder %s565_s12, 1 }
  0x15   : > { %p159_p1 = scmp.lt.s32.totalorder %s565_s12, 3  ;;  %s118_s5 = scalar_lea.sflag [#allocation3], %s645_s23 }
  0x16   : > { %s435_s6 = sshra.s32 %s128_s29, 4  ;;  %p439_p3 = pneg %p658_p13  ;;  %s436_s6 = int_to_ptr.hbm [resolvable:$true] %s435_s6 }
  0x17   : > { %s437_s7 = scalar_lea.hbm %s436_s6, 16  ;;  %s442_s16 = scalar_lea.hbm %s754_s0, 32 }
  0x18   : > { %p438_p2 = scmp.ne.s32.totalorder %s436_s6, %s437_s7  ;;  %p443_p5 = scmp.lt.s32.totalorder %s436_s6, %s754_s0 }
  0x19   : > { %p444_p8 = scmp.lt.s32.totalorder %s442_s16, %s437_s7 }
  0x1a   : > { %p440_p4 = pnand %p439_p3, %p438_p2 }
  0x1b   : > { %p445_p10 = por %p444_p8, %p443_p5 }
  0x1c   : > { %p441_p7 = pneg %p440_p4 }
  0x1e   : > { %p446_p9 = pnand %p445_p10, %p441_p7 }
  0x20   : > { %449 = shalt.err (!%p446_p9)
}
  0x21   : > { %s567_s26 = smov 128   ;;  %s568_s27 = smov 8  }
  0x22   : > { %389 = dma.hbm_to_vmem [thread:$0]  (!%p658_p13), %s128_s29, 256, %s130_s3, %s118_s5, %s567_s26, %s567_s26, %s568_s27  }
  0x23   : > { %p682_p2 = pnand %p364_p0, %p159_p1  ;;  %s148_s7 = scalar_lea.hbm %s755_s1, %s375_s24 }
  0x24   : > { %s149_s8 = sshll.u32 %s148_s7, 4  ;;  %s143_s14 = scalar_lea.vmem [#allocation5], %s358_s25  ;;  %s150_s8 = int_to_ptr.hbm [resolvable:$true] %s149_s8 }
  0x25   : > { %s151_s16 = sshll.u32 %s143_s14, 4  ;;  %s140_s17 = scalar_lea.sflag [#allocation6], %s645_s23  ;;  %s152_s16 = int_to_ptr.vmem [resolvable:$true] %s151_s16 }
  0x26   : > { %s465_s19 = sshra.s32 %s150_s8, 4  ;;  %s472_s30 = scalar_lea.hbm %s755_s1, 32  ;;  %s466_s19 = int_to_ptr.hbm [resolvable:$true] %s465_s19 }
  0x27   : > { %s467_s29 = scalar_lea.hbm %s466_s19, 16  ;;  %p473_p4 = scmp.lt.s32.totalorder %s466_s19, %s755_s1 }
  0x28   : > { %p468_p9 = scmp.ne.s32.totalorder %s466_s19, %s467_s29  ;;  %p474_p7 = scmp.lt.s32.totalorder %s472_s30, %s467_s29 }
  0x2a   : > { %p470_p0 = pnand %p468_p9, %p439_p3  ;;  %p475_p5 = por %p474_p7, %p473_p4 }
  0x2c   : > { %p471_p1 = pneg %p470_p0 }
  0x2e   : > { %p476_p8 = pnand %p475_p5, %p471_p1 }
  0x30   : > { %479 = shalt.err (!%p476_p8)
}
  0x31   : > { %392 = dma.hbm_to_vmem [thread:$0]  (!%p658_p13), %s150_s8, 256, %s152_s16, %s140_s17, %s567_s26, %s567_s26, %s568_s27  }
  0x32   : > { %163 = sbr.rel (%p682_p2) target bundleno = 193 (0xc1), region = 28  ;;  %s708_s23 = sand.u32 (!%p682_p2), 1, %s557_s10  }
  0x33   : > { %s365_s25 = sshll.u32 (!%p682_p2), %s708_s23, 4  ;;  %s166_s7 = scalar_lea.sflag (!%p682_p2), [#allocation3], %s708_s23 }
  0x34   : > { %s169_s14 = scalar_lea.vmem (!%p682_p2), [#allocation2], %s365_s25 }
  0x37   : > { %540 = dma.done.wait (%p629_p6), %s166_s7, 256  }
  0x38   : > { %542 = vsyncadd (%p629_p6), %s166_s7, 4294967040  ;;  %s176_s4 = scalar_lea.sflag [#allocation6], %s708_s23  ;;  %s179_s26 = scalar_lea.vmem [#allocation5], %s365_s25 }
  0x39   : > { %544 = dma.done.wait (%p629_p6), %s176_s4, 256  }
  0x3a   : > { %546 = vsyncadd (%p629_p6), %s176_s4, 4294967040  ;;  %v209_v0 = vld [vmem:[%s179_s26 + $0x8] sm:$0xff]  ;;  %v208_v1 = vld [vmem:[%s179_s26] sm:$0xff]  ;;  %vm210_vm0 = vcmask 130048   ;;  %s377_s27 = sshll.u32 %s607_s13, 4  ;;  %s205_s20 = scalar_lea.vmem [#allocation7], %s365_s25 }
  0x3b   : > { %231 = vmatpush.msra.mxu0 %v209_v0  ;;  %378 = vmatpush.msra.mxu1 %v209_v0  ;;  %v206_v2 = vld [vmem:[%s169_s14] sm:$0xff]  ;;  %v207_v3 = vld [vmem:[%s169_s14 + $0x8] sm:$0xff]  ;;  %s255_s16 = scalar_lea.hbm %s756_s2, %s377_s27  ;;  %s256_s17 = sshll.u32 %s205_s20, 4  ;;  %vm240_vm1 = vcmask 261120   ;;  %s257_s17 = int_to_ptr.vmem [resolvable:$true] %s256_s17 }
  0x3c   : > { %s258_s19 = sshll.u32 %s255_s16, 4  ;;  %s244_s29 = scalar_lea.sflag [#allocation4], %s708_s23  ;;  %s259_s19 = int_to_ptr.hbm [resolvable:$true] %s258_s19 }
  0x3d   : > { %232 = vmatpush.msra.mxu0 %v208_v1  ;;  %379 = vmatpush.msra.mxu1 %v208_v1  ;;  %s509_s3 = sshra.s32 %s259_s19, 4  ;;  %s515_s24 = scalar_lea.hbm %s756_s2, 32  ;;  %s510_s3 = int_to_ptr.hbm [resolvable:$true] %s509_s3 }
  0x3e   : > { %368 = vmatmul.msk.f32.vlgmr.msra.gmra.mxu0 %vm210_vm0, %v206_v2  ;;  %369 = vmatmul.msk.f32.vlgmr.msra.gmra.mxu1 %vm210_vm0, %v207_v3  ;;  %s511_s5 = scalar_lea.hbm %s510_s3, 16  ;;  %p516_p10 = scmp.lt.s32.totalorder %s510_s3, %s756_s2 }
  0x3f   : > { %p512_p6 = scmp.ne.s32.totalorder %s510_s3, %s511_s5  ;;  %p517_p2 = scmp.lt.s32.totalorder %s515_s24, %s511_s5 }
  0x41   : > { %p513_p13 = pnand %p512_p6, %p636_p11  ;;  %p518_p9 = por %p517_p2, %p516_p10 }
  0x43   : > { %p514_p3 = pneg %p513_p13 }
  0x45   : > { %p519_p0 = pnand %p518_p9, %p514_p3 }
  0xbb   : > { %v234_v4 = vpop.f32.mrf.mxu0  ;;  %v237_v5 = vpop.f32.mrf.mxu1 }
  0xbc   : > { %241 = vst.msk [vmem:[%s205_s20] sm:$0xff] %vm240_vm1, %v234_v4 }
  0xbd   : > { %242 = vst.msk [vmem:[%s205_s20 + $0x8] sm:$0xff] %vm240_vm1, %v237_v5 }
  0xbe   : > { %522 = shalt.err (!%p519_p0)
}
  0xbf   : > { %s569_s23 = smov 128   ;;  %s570_s7 = smov 8  }
  0xc0   : > { %384 = dma.vmem_to_hbm [thread:$0]  (%p636_p11), %s257_s17, 256, %s259_s19, %s244_s29, %s569_s23, %s569_s23, %s570_s7  }
  0xc1 PF: > { %s273_s14 = sand.u32 1, %s553_s9   ;;  %p763_p1 = scmp.ge.s32.totalorder %s565_s12, 2 }
  0xc2   : > { %s274_s4 = scalar_lea.sflag [#allocation4], %s273_s14 }
  0xc3   : > { %p394_p4 = pnand %p763_p1, %p640_p12 }
  0xc5   : > { %p395_p7 = pneg %p394_p4 }
  0xc7   : > { %548 = dma.done.wait (%p395_p7), %s274_s4, 256  }
  0xc8   : > { %550 = vsyncadd (%p395_p7), %s274_s4, 4294967040  ;;  %p18_p5 = scmp.ge.s32.totalorder %s611_s15, 4   ;;  %s764_s9 = smov %s557_s10 }
  0xc9   : > { %s765_s10 = smov %s561_s11  ;;  %s766_s11 = smov %s623_s18 }
  0xca   : > { %s767_s12 = smov %s611_s15  ;;  %20 = sbr.rel (!%p18_p5) target bundleno = 7 (0x7), region = 86 }
  0xcf   :  { %280 = vsyncpa [#allocation3], 1 }
  0xd0   :  { %282 = vsyncpa [#allocation3 + $0x1], 1 }
  0xd1   :  { %283 = vsyncpa [#allocation6], 1 }
  0xd2   :  { %285 = vsyncpa [#allocation6 + $0x1], 1 }
  0xd3   :  { %286 = vsyncpa [#allocation4], 1 }
  0xd4   :  { %288 = vsyncpa [#allocation4 + $0x1], 1 }

</bundles_post_ra>
